<compile_context>
chip_gen: v7x
topology: tpu7x:2x2x1
jax: 0.10.0
libtpu: 0.0.40
codegen_flags: <defaults>
</compile_context>

<pallas_src>
import jax
import jax.numpy as jnp
import numpy as np
from jax import lax
from jax.experimental import pallas as pl
from jax.experimental.pallas import tpu as pltpu


def _vmem_budget_bytes():
    """~75% of this generation's per-core VMEM (fallback: 64 MiB physical)."""
    try:
        cap = int(pltpu.get_tpu_info().vmem_capacity_bytes)
    except Exception:
        cap = 64 * 2**20
    return (3 * cap) // 4


def _pick_batch_block(n, per_batch_row_bytes, fixed_bytes, budget):
    """Batch rows per grid step.

    n <= 8       -> one fully sublane-packed step (splitting tiny N only adds
                    per-step overhead and quarter-utilized sublanes).
    n % 8 == 0   -> Nb = 8 (dense sublanes + multiple steps for pipelining and
                    v7x's two TensorCores).
    otherwise    -> whole batch if it fits, else largest divisor <= 8.
    Candidates are accepted only if the double-buffered working set fits the
    VMEM budget (clamp Nb rather than clamping the VMEM limit).
    """
    if n <= 8:
        cands = [n]
    elif n % 8 == 0:
        cands = [8, n]
    else:
        cands = [n] + [d for d in range(8, 0, -1) if n % d == 0]
    for nb in cands:
        if fixed_bytes + 2 * nb * per_batch_row_bytes <= budget:
            return nb
    # TODO(synk): add an 'arbitrary' grid axis over C when even the smallest
    # batch block overflows VMEM.
    return cands[-1]


def make_spatial_attention(N, C, H, W, kernel_size=7):
    assert kernel_size in (3, 7), "kernel size must be 3 or 7"
    K = kernel_size
    PAD = 3 if K == 7 else 1
    HW = H * W
    HWp = ((HW + 127) // 128) * 128          # lane-dense padded spatial size

    # ---- trace-time constants: scatter pattern of the conv-as-matmul matrix -
    oh, ow = np.meshgrid(np.arange(H), np.arange(W), indexing="ij")
    oh = oh.reshape(-1)
    ow = ow.reshape(-1)
    src_np = np.zeros((K * K, HW), np.int32)     # source pixel per (tap, out-pixel)
    val_np = np.zeros((K * K, HW), np.float32)   # 1.0 where the tap is in-bounds
    for kh in range(K):
        for kw in range(K):
            ih = oh + kh - PAD
            iw = ow + kw - PAD
            ok = (ih >= 0) & (ih < H) & (iw >= 0) & (iw < W)
            t = kh * K + kw
            src_np[t] = np.where(ok, ih * W + iw, 0)
            val_np[t] = ok.astype(np.float32)
    src_idx = jnp.asarray(src_np)                                  # (K*K, HW)
    col_idx = jnp.asarray(np.tile(np.arange(HW, dtype=np.int32), (K * K, 1)))
    tap_valid = jnp.asarray(val_np)                                # (K*K, HW)

    # ---- generation-aware VMEM budgeting & batch blocking --------------------
    itemsize = 4                                   # f32 path
    budget = _vmem_budget_bytes()
    a_bytes = 2 * (2 * HWp * HWp * 4)              # double-buffered A block
    per_row = (C * HWp + HWp) * itemsize           # one batch row of x + output
    Nb = _pick_batch_block(N, per_row, a_bytes + (1 << 20), budget)
    assert N % Nb == 0
    num_steps = N // Nb

    # ---- channel-reduction chunking (bounded vreg pressure) ------------------
    C_CHUNK = 1
    for cc in range(1, min(C, 32) + 1):
        if C % cc == 0:
            C_CHUNK = cc
    n_chunks = C // C_CHUNK

    def kernel(a_ref, x_ref, o_ref):
        # a_ref: (2, HWp, HWp) f32 conv-as-matmul matrices (0: avg, 1: max)
        # x_ref: (Nb, C, HWp)
        # o_ref: (Nb, HWp)
        def chunk_stats(c0):
            xc = x_ref[:, pl.ds(c0, C_CHUNK), :].astype(jnp.float32)
            return jnp.sum(xc, axis=1), jnp.max(xc, axis=1)

        s, m = chunk_stats(0)
        if n_chunks > 1:
            def body(i, carry):
                s_acc, m_acc = carry
                sc, mc = chunk_stats(i * C_CHUNK)
                return s_acc + sc, jnp.maximum(m_acc, mc)
            s, m = lax.fori_loop(1, n_chunks, body, (s, m))

        avg = s * jnp.float32(1.0 / C)                              # (Nb, HWp)
        y = (jnp.dot(avg, a_ref[0], preferred_element_type=jnp.float32) +
             jnp.dot(m,   a_ref[1], preferred_element_type=jnp.float32))
        o_ref[...] = jax.nn.sigmoid(y).astype(o_ref.dtype)

    def spatial_attention(x, conv_w):
        # x: (N, C, H, W)   conv_w: (1, 2, K, K)  (in-channel 0 = avg, 1 = max)
        x_flat = x.reshape(N, C, HW)
        if HWp != HW:
            x_flat = jnp.pad(x_flat, ((0, 0), (0, 0), (0, HWp - HW)))

        # Fold conv weights + zero padding into the (2, HWp, HWp) matrix.
        # (Tiny weight preprocessing, not input-data pre-scaling.)
        w_flat = conv_w.reshape(2, K * K).astype(jnp.float32)       # (2, K*K)
        base = jnp.zeros((HWp, HWp), jnp.float32)
        a_avg = base.at[src_idx, col_idx].add(w_flat[0][:, None] * tap_valid)
        a_max = base.at[src_idx, col_idx].add(w_flat[1][:, None] * tap_valid)
        a_mat = jnp.stack([a_avg, a_max], axis=0)                   # (2, HWp, HWp)

        out = pl.pallas_call(
            kernel,
            out_shape=jax.ShapeDtypeStruct((N, HWp), x.dtype),
            grid=(num_steps,),
            in_specs=[
                # Constant index_map -> block fetched once across the grid.
                pl.BlockSpec((2, HWp, HWp), lambda n: (0, 0, 0)),   # A
                pl.BlockSpec((Nb, C, HWp), lambda n: (n, 0, 0)),    # x
            ],
            out_specs=pl.BlockSpec((Nb, HWp), lambda n: (n, 0)),
            compiler_params=pltpu.CompilerParams(
                dimension_semantics=("parallel",),
                vmem_limit_bytes=budget),
        )(a_mat, x_flat)

        out = out[:, :HW] if HWp != HW else out
        return out.reshape(N, 1, H, W)

    return jax.jit(spatial_attention)


def reference(x, conv_w, pad):
    avg = jnp.mean(x, axis=1, keepdims=True)
    mx = jnp.max(x, axis=1, keepdims=True)
    cat = jnp.concatenate([avg, mx], axis=1)
    y = jax.lax.conv_general_dilated(
        cat, conv_w, window_strides=(1, 1),
        padding=[(pad, pad), (pad, pad)],
        dimension_numbers=("NCHW", "OIHW", "NCHW"))
    return jax.nn.sigmoid(y)


if __name__ == "__main__":
    N, C, H, W = 2, 4, 16, 16
    K = 7
    PAD = 3

    key = jax.random.PRNGKey(0)
    kx, kw = jax.random.split(key)
    x = jax.random.normal(kx, (N, C, H, W), dtype=jnp.float32)

    # PyTorch-style kaiming-uniform bound 1/sqrt(fan_in), no bias.
    fan_in = 2 * K * K
    bound = 1.0 / np.sqrt(fan_in)
    conv_w = jax.random.uniform(kw, (1, 2, K, K), dtype=jnp.float32,
                                minval=-bound, maxval=bound)

    fn = make_spatial_attention(N, C, H, W, kernel_size=K)
    out = jax.block_until_ready(fn(x, conv_w))

    ref = jax.block_until_ready(reference(x, conv_w, PAD))
    np.testing.assert_allclose(np.asarray(out), np.asarray(ref),
                               rtol=1e-4, atol=1e-4)

    print("KERNEL_OK")
</pallas_src>

<mosaic_0001>
module attributes {stable_mosaic.version = 11 : i64} {
  func.func private @main(%arg0: i32) attributes {dimension_semantics = [#tpu.dimension_semantics<core_parallel>], iteration_bounds = array<i64: 2>, tpu.core_type = #tpu.core_type<sc_scalar_subcore>, window_params = []} {
    return
  }
}

module attributes {stable_mosaic.version = 11 : i64} {
  func.func private @main(%arg0: i32) attributes {dimension_semantics = [#tpu.dimension_semantics<core_parallel>], iteration_bounds = array<i64: 2>, tpu.core_type = #tpu.core_type<sc_scalar_subcore>, window_params = []} {
    return
  }
}

module attributes {stable_mosaic.version = 11 : i64} {
  func.func @kernel(%arg0: i32, %arg1: memref<2x256x256xf32, #tpu.memory_space<vmem>>, %arg2: memref<2x4x256xf32, #tpu.memory_space<vmem>>, %arg3: memref<2x256xf32, #tpu.memory_space<vmem>>) attributes {dimension_semantics = [#tpu.dimension_semantics<parallel>], iteration_bounds = array<i64: 1>, scalar_prefetch = 0 : i64, scratch_operands = 0 : i64, tpu.core_type = #tpu.core_type<tc>, window_params = [{pipeline_mode = #tpu.pipeline_mode<synchronous>, transform_indices = @transform_0, window_bounds = array<i64: 2, 256, 256>}, {transform_indices = @transform_1, window_bounds = array<i64: 2, 4, 256>}, {transform_indices = @transform_2, window_bounds = array<i64: 2, 256>}]} {
    %c0 = arith.constant 0 : index
    %c0_0 = arith.constant 0 : index
    %c0_1 = arith.constant 0 : index
    %0 = vector.load %arg2[%c0, %c0_0, %c0_1] : memref<2x4x256xf32, #tpu.memory_space<vmem>>, vector<2x4x256xf32>
    %cst = arith.constant dense<0.000000e+00> : vector<2x256xf32>
    %1 = vector.multi_reduction <add>, %0, %cst [1] : vector<2x4x256xf32> to vector<2x256xf32>
    %cst_2 = arith.constant dense<0xFF800000> : vector<2x256xf32>
    %2 = vector.multi_reduction <maximumf>, %0, %cst_2 [1] : vector<2x4x256xf32> to vector<2x256xf32>
    %cst_3 = arith.constant 2.500000e-01 : f32
    %3 = vector.broadcast %cst_3 : f32 to vector<2x256xf32>
    %4 = arith.mulf %1, %3 : vector<2x256xf32>
    %c0_4 = arith.constant 0 : index
    %c0_5 = arith.constant 0 : index
    %c0_6 = arith.constant 0 : index
    %5 = vector.load %arg1[%c0_4, %c0_5, %c0_6] : memref<2x256x256xf32, #tpu.memory_space<vmem>>, vector<1x256x256xf32>
    %6 = vector.shape_cast %5 : vector<1x256x256xf32> to vector<256x256xf32>
    %cst_7 = arith.constant dense<0.000000e+00> : vector<2x256xf32>
    %7 = tpu.matmul %4, %6, %cst_7 {dimension_numbers = #tpu.dot_dimension_numbers<[1], [0], [0], [1], [0, 0, 1, 1], [], []>} : vector<2x256xf32>, vector<256x256xf32>, vector<2x256xf32> -> vector<2x256xf32>
    %c1 = arith.constant 1 : index
    %c0_8 = arith.constant 0 : index
    %c0_9 = arith.constant 0 : index
    %8 = vector.load %arg1[%c1, %c0_8, %c0_9] : memref<2x256x256xf32, #tpu.memory_space<vmem>>, vector<1x256x256xf32>
    %9 = vector.shape_cast %8 : vector<1x256x256xf32> to vector<256x256xf32>
    %cst_10 = arith.constant dense<0.000000e+00> : vector<2x256xf32>
    %10 = tpu.matmul %2, %9, %cst_10 {dimension_numbers = #tpu.dot_dimension_numbers<[1], [0], [0], [1], [0, 0, 1, 1], [], []>} : vector<2x256xf32>, vector<256x256xf32>, vector<2x256xf32> -> vector<2x256xf32>
    %11 = arith.addf %7, %10 : vector<2x256xf32>
    %12 = arith.negf %11 : vector<2x256xf32>
    %13 = math.exp %12 : vector<2x256xf32>
    %cst_11 = arith.constant 1.000000e+00 : f32
    %14 = vector.broadcast %cst_11 : f32 to vector<2x256xf32>
    %15 = arith.addf %14, %13 : vector<2x256xf32>
    %16 = arith.divf %14, %15 : vector<2x256xf32>
    %c0_12 = arith.constant 0 : index
    %c0_13 = arith.constant 0 : index
    %17 = vector.load %arg3[%c0_12, %c0_13] : memref<2x256xf32, #tpu.memory_space<vmem>>, vector<2x256xf32>
    tpu.vector_store %arg3[%c0_12, %c0_13], %16 {strides = array<i32>} : memref<2x256xf32, #tpu.memory_space<vmem>>, vector<2x256xf32>,
    return
  }
  func.func @transform_0(%arg0: i32) -> (i32, i32, i32) {
    %c0_i32 = arith.constant 0 : i32
    %c0_i32_0 = arith.constant 0 : i32
    %c0_i32_1 = arith.constant 0 : i32
    %c0_i32_2 = arith.constant 0 : i32
    return %c0_i32, %c0_i32_0, %c0_i32_1 : i32, i32, i32
  }
  func.func @transform_1(%arg0: i32) -> (i32, i32, i32) {
    %c0_i32 = arith.constant 0 : i32
    %c0_i32_0 = arith.constant 0 : i32
    %c0_i32_1 = arith.constant 0 : i32
    return %arg0, %c0_i32, %c0_i32_0 : i32, i32, i32
  }
  func.func @transform_2(%arg0: i32) -> (i32, i32) {
    %c0_i32 = arith.constant 0 : i32
    %c0_i32_0 = arith.constant 0 : i32
    return %arg0, %c0_i32 : i32, i32
  }
}

</mosaic_0001>

<bundles_post_ra>
// kernel: mul.9
= control target key start
LH: loop header
LB: loop body
LE: loop exit
PB: predicated region body
PF: predicated region fallthrough
CT: control target
= control target key end

     0   :  { %s59_s10 = smov 42   ;;  %s60_s11 = smov 28   ;;  %vm3_vm0 = vcmask 56320   ;;  %vm9_vm1 = vcmask 400720   ;;  %vm15_vm2 = vcmask 343320   ;;  %vm21_vm3 = vcmask 285920   ;;  %s99_s0 = inlined_call_operand.vmem [shape: f32[7,7], index: 0, kind: input, shape index: {}]   ;;  %s100_s1 = inlined_call_operand.vmem [shape: f32[49], index: 1, kind: output, shape index: {}]  }
   0x1   :  { %v47_v0 = vld [vmem:[%s99_s0 + $0x6] sm:$0x1]   ;;  %v49_v1 = vld [vmem:[%s99_s0 + $0x4] sm:$0x1]   ;;  %v48_v2 = vld [vmem:[%s99_s0 + $0x5] sm:$0x1]  }
   0x2   :  { %7 = vrot.lane.b32.xlu0 %v47_v0, %s59_s10  ;;  %19 = vrot.lane.b32.xlu1 %v49_v1, %s60_s11  ;;  %v50_v3 = vld [vmem:[%s99_s0 + $0x3] sm:$0x1]   ;;  %v2_v4 = vld [vmem:[%s99_s0] sm:$0x1]   ;;  %s61_s18 = smov 35   ;;  %s62_s19 = smov 21  }
   0x3   :  { %4 = vst.msk [vmem:[#allocation0] sm:$0x1] %vm3_vm0, %v2_v4   ;;  %v51_v5 = vld [vmem:[%s99_s0 + $0x2] sm:$0x1]   ;;  %v52_v6 = vld [vmem:[%s99_s0 + $0x1] sm:$0x1]  }
   0x4   :  { %s63_s0 = smov 14   ;;  %s64_s24 = smov 7   ;;  %vm27_vm4 = vcmask 228520   ;;  %vm33_vm5 = vcmask 171120   ;;  %vm39_vm6 = vcmask 113720  }
   0x6   :  { %13 = vrot.lane.b32.xlu0 %v48_v2, %s61_s18  ;;  %25 = vrot.lane.b32.xlu1 %v50_v3, %s62_s19 }
   0xa   :  { %31 = vrot.lane.b32.xlu0 %v51_v5, %s63_s0  ;;  %37 = vrot.lane.b32.xlu1 %v52_v6, %s64_s24 }
  0x74   :  { %v8_v7 = vpop.permute.xlu0 %7   ;;  %v20_v8 = vpop.permute.xlu1 %19  }
  0x75   :  { %10 = vst.msk [vmem:[#allocation0] sm:$0x1] %vm9_vm1, %v8_v7  }
  0x78   :  { %v14_v9 = vpop.permute.xlu0 %13   ;;  %v26_v10 = vpop.permute.xlu1 %25  }
  0x79   :  { %16 = vst.msk [vmem:[#allocation0] sm:$0x1] %vm15_vm2, %v14_v9  }
  0x7a   :  { %22 = vst.msk [vmem:[#allocation0] sm:$0x1] %vm21_vm3, %v20_v8  }
  0x7b   :  { %28 = vst.msk [vmem:[#allocation0] sm:$0x1] %vm27_vm4, %v26_v10  }
  0x7c   :  { %v32_v11 = vpop.permute.xlu0 %31   ;;  %v38_v12 = vpop.permute.xlu1 %37  }
  0x7d   :  { %34 = vst.msk [vmem:[#allocation0] sm:$0x1] %vm33_vm5, %v32_v11  }
  0x7e   :  { %40 = vst.msk [vmem:[#allocation0] sm:$0x1] %vm39_vm6, %v38_v12  }
  0x85   :  { %v44_v13 = vld [vmem:[#allocation0] sm:$0x1] }
  0x86   :  { %46 = vst [vmem:[%s100_s1] sm:$0x1] %v44_v13 }

// kernel: spatial_attention.1
= control target key start
LH: loop header
LB: loop body
LE: loop exit
PB: predicated region body
PF: predicated region fallthrough
CT: control target
= control target key end

     0   :  { %vm19_vm0 = vcmask 1043456   ;;  %vm213_vm1 = vcmask 1041409   ;;  %s1161_s0 = inlined_call_operand.vmem [shape: f32[2,256,256], index: 0, kind: input, shape index: {}]   ;;  %s1162_s1 = inlined_call_operand.vmem [shape: f32[2,4,256], index: 1, kind: input, shape index: {}]   ;;  %s1163_s2 = inlined_call_operand.vmem [shape: f32[2,256], index: 2, kind: output, shape index: {}]  }
   0x1   :  { %v397_v0 = vld [vmem:[%s1161_s0 + $0x208] sm:$0xff]  ;;  %v399_v1 = vld [vmem:[%s1161_s0 + $0x218] sm:$0xff]  ;;  %v396_v5 = vld [vmem:[%s1161_s0 + $0x200] sm:$0xff] }
   0x2   :  { %v81_v2 = vld [vmem:[%s1161_s0 + $0x8] sm:$0xff]  ;;  %v463_v3 = vpack.c.bf16 %v399_v1, %v397_v0  ;;  %v83_v4 = vld [vmem:[%s1161_s0 + $0x18] sm:$0xff]  ;;  %v398_v6 = vld [vmem:[%s1161_s0 + $0x210] sm:$0xff] }
   0x3   :  { %v527_v7 = vpack.c.bf16 %v83_v4, %v81_v2  ;;  %v465_v8 = vpack.c.bf16 %v398_v6, %v396_v5  ;;  %v80_v9 = vld [vmem:[%s1161_s0] sm:$0xff]  ;;  %v82_v10 = vld [vmem:[%s1161_s0 + $0x10] sm:$0xff]  ;;  %v401_v11 = vld [vmem:[%s1161_s0 + $0x228] sm:$0xff] }
   0x4   :  { %464 = vmatprep.subr.bf16.mxu1 %v463_v3  ;;  %v529_v12 = vpack.c.bf16 %v82_v10, %v80_v9  ;;  %v403_v13 = vld [vmem:[%s1161_s0 + $0x238] sm:$0xff]  ;;  %v85_v14 = vld [vmem:[%s1161_s0 + $0x28] sm:$0xff]  ;;  %v400_v18 = vld [vmem:[%s1161_s0 + $0x220] sm:$0xff] }
   0x5   :  { %v87_v15 = vld [vmem:[%s1161_s0 + $0x38] sm:$0xff]  ;;  %528 = vmatprep.subr.bf16.mxu0 %v527_v7  ;;  %466 = vmatpush1.bf16.msra.mxu1 %v465_v8  ;;  %v467_v16 = vpack.c.bf16 %v403_v13, %v401_v11  ;;  %v402_v19 = vld [vmem:[%s1161_s0 + $0x230] sm:$0xff]  ;;  %v84_v20 = vld [vmem:[%s1161_s0 + $0x20] sm:$0xff] }
   0x6   :  { %v531_v17 = vpack.c.bf16 %v87_v15, %v85_v14  ;;  %530 = vmatpush1.bf16.msra.mxu0 %v529_v12  ;;  %v469_v21 = vpack.c.bf16 %v402_v19, %v400_v18  ;;  %v86_v22 = vld [vmem:[%s1161_s0 + $0x30] sm:$0xff]  ;;  %v405_v23 = vld [vmem:[%s1161_s0 + $0x248] sm:$0xff]  ;;  %v407_v24 = vld [vmem:[%s1161_s0 + $0x258] sm:$0xff] }
   0x7   :  { %468 = vmatprep.subr.bf16.mxu1 %v467_v16  ;;  %v533_v25 = vpack.c.bf16 %v86_v22, %v84_v20  ;;  %v471_v26 = vpack.c.bf16 %v407_v24, %v405_v23  ;;  %v89_v27 = vld [vmem:[%s1161_s0 + $0x48] sm:$0xff]  ;;  %v91_v28 = vld [vmem:[%s1161_s0 + $0x58] sm:$0xff]  ;;  %v404_v29 = vld [vmem:[%s1161_s0 + $0x240] sm:$0xff] }
   0x8   :  { %532 = vmatprep.subr.bf16.mxu0 %v531_v17  ;;  %v535_v30 = vpack.c.bf16 %v91_v28, %v89_v27  ;;  %v406_v31 = vld [vmem:[%s1161_s0 + $0x250] sm:$0xff]  ;;  %v88_v32 = vld [vmem:[%s1161_s0 + $0x40] sm:$0xff]  ;;  %v409_v35 = vld [vmem:[%s1161_s0 + $0x268] sm:$0xff] }
   0x9   :  { %v90_v33 = vld [vmem:[%s1161_s0 + $0x50] sm:$0xff]  ;;  %470 = vmatpush1.bf16.msra.mxu1 %v469_v21  ;;  %v473_v34 = vpack.c.bf16 %v406_v31, %v404_v29  ;;  %v411_v36 = vld [vmem:[%s1161_s0 + $0x278] sm:$0xff]  ;;  %v93_v37 = vld [vmem:[%s1161_s0 + $0x68] sm:$0xff] }
   0xa   :  { %534 = vmatpush1.bf16.msra.mxu0 %v533_v25  ;;  %472 = vmatprep.subr.bf16.mxu1 %v471_v26  ;;  %v537_v38 = vpack.c.bf16 %v90_v33, %v88_v32  ;;  %v475_v39 = vpack.c.bf16 %v411_v36, %v409_v35  ;;  %v95_v40 = vld [vmem:[%s1161_s0 + $0x78] sm:$0xff]  ;;  %v408_v41 = vld [vmem:[%s1161_s0 + $0x260] sm:$0xff]  ;;  %v410_v42 = vld [vmem:[%s1161_s0 + $0x270] sm:$0xff] }
   0xb   :  { %536 = vmatprep.subr.bf16.mxu0 %v535_v30  ;;  %v539_v43 = vpack.c.bf16 %v95_v40, %v93_v37  ;;  %v92_v44 = vld [vmem:[%s1161_s0 + $0x60] sm:$0xff]  ;;  %v94_v45 = vld [vmem:[%s1161_s0 + $0x70] sm:$0xff]  ;;  %v413_v46 = vld [vmem:[%s1161_s0 + $0x288] sm:$0xff]  ;;  %v477_v50 = vpack.c.bf16 %v410_v42, %v408_v41 }
   0xc   :  { %v415_v47 = vld [vmem:[%s1161_s0 + $0x298] sm:$0xff]  ;;  %v97_v48 = vld [vmem:[%s1161_s0 + $0x88] sm:$0xff]  ;;  %v541_v51 = vpack.c.bf16 %v94_v45, %v92_v44  ;;  %v412_v53 = vld [vmem:[%s1161_s0 + $0x280] sm:$0xff] }
   0xd   :  { %v99_v49 = vld [vmem:[%s1161_s0 + $0x98] sm:$0xff]  ;;  %474 = vmatpush1.bf16.msra.mxu1 %v473_v34  ;;  %v479_v52 = vpack.c.bf16 %v415_v47, %v413_v46  ;;  %v414_v54 = vld [vmem:[%s1161_s0 + $0x290] sm:$0xff]  ;;  %v96_v55 = vld [vmem:[%s1161_s0 + $0x80] sm:$0xff] }
   0xe   :  { %538 = vmatpush1.bf16.msra.mxu0 %v537_v38  ;;  %476 = vmatprep.subr.bf16.mxu1 %v475_v39  ;;  %v543_v56 = vpack.c.bf16 %v99_v49, %v97_v48  ;;  %v98_v57 = vld [vmem:[%s1161_s0 + $0x90] sm:$0xff]  ;;  %v417_v58 = vld [vmem:[%s1161_s0 + $0x2a8] sm:$0xff]  ;;  %v419_v59 = vld [vmem:[%s1161_s0 + $0x2b8] sm:$0xff]  ;;  %v481_v62 = vpack.c.bf16 %v414_v54, %v412_v53 }
   0xf   :  { %540 = vmatprep.subr.bf16.mxu0 %v539_v43  ;;  %v101_v60 = vld [vmem:[%s1161_s0 + $0xa8] sm:$0xff]  ;;  %v103_v61 = vld [vmem:[%s1161_s0 + $0xb8] sm:$0xff]  ;;  %v545_v63 = vpack.c.bf16 %v98_v57, %v96_v55  ;;  %v483_v0 = vpack.c.bf16 %v419_v59, %v417_v58  ;;  %v416_v1 = vld [vmem:[%s1161_s0 + $0x2a0] sm:$0xff] }
  0x10   :  { %v418_v2 = vld [vmem:[%s1161_s0 + $0x2b0] sm:$0xff]  ;;  %v100_v3 = vld [vmem:[%s1161_s0 + $0xa0] sm:$0xff]  ;;  %v547_v4 = vpack.c.bf16 %v103_v61, %v101_v60  ;;  %v421_v6 = vld [vmem:[%s1161_s0 + $0x2c8] sm:$0xff] }
  0x11   :  { %478 = vmatpush1.bf16.msra.mxu1 %v477_v50  ;;  %v102_v5 = vld [vmem:[%s1161_s0 + $0xb0] sm:$0xff]  ;;  %v423_v7 = vld [vmem:[%s1161_s0 + $0x2d8] sm:$0xff]  ;;  %v105_v8 = vld [vmem:[%s1161_s0 + $0xc8] sm:$0xff]  ;;  %v485_v10 = vpack.c.bf16 %v418_v2, %v416_v1 }
  0x12   :  { %542 = vmatpush1.bf16.msra.mxu0 %v541_v51  ;;  %480 = vmatprep.subr.bf16.mxu1 %v479_v52  ;;  %v107_v9 = vld [vmem:[%s1161_s0 + $0xd8] sm:$0xff]  ;;  %v549_v11 = vpack.c.bf16 %v102_v5, %v100_v3  ;;  %v487_v12 = vpack.c.bf16 %v423_v7, %v421_v6  ;;  %v420_v13 = vld [vmem:[%s1161_s0 + $0x2c0] sm:$0xff]  ;;  %v422_v14 = vld [vmem:[%s1161_s0 + $0x2d0] sm:$0xff] }
  0x13   :  { %544 = vmatprep.subr.bf16.mxu0 %v543_v56  ;;  %v104_v15 = vld [vmem:[%s1161_s0 + $0xc0] sm:$0xff]  ;;  %v551_v16 = vpack.c.bf16 %v107_v9, %v105_v8  ;;  %v106_v17 = vld [vmem:[%s1161_s0 + $0xd0] sm:$0xff]  ;;  %v425_v18 = vld [vmem:[%s1161_s0 + $0x2e8] sm:$0xff]  ;;  %v489_v22 = vpack.c.bf16 %v422_v14, %v420_v13 }
  0x14   :  { %v427_v19 = vld [vmem:[%s1161_s0 + $0x2f8] sm:$0xff]  ;;  %v109_v20 = vld [vmem:[%s1161_s0 + $0xe8] sm:$0xff]  ;;  %v553_v23 = vpack.c.bf16 %v106_v17, %v104_v15  ;;  %v424_v25 = vld [vmem:[%s1161_s0 + $0x2e0] sm:$0xff] }
  0x15   :  { %482 = vmatpush1.bf16.msra.mxu1 %v481_v62  ;;  %v111_v21 = vld [vmem:[%s1161_s0 + $0xf8] sm:$0xff]  ;;  %v491_v24 = vpack.c.bf16 %v427_v19, %v425_v18  ;;  %v426_v26 = vld [vmem:[%s1161_s0 + $0x2f0] sm:$0xff]  ;;  %v108_v27 = vld [vmem:[%s1161_s0 + $0xe0] sm:$0xff] }
  0x16   :  { %546 = vmatpush1.bf16.msra.mxu0 %v545_v63  ;;  %484 = vmatprep.subr.bf16.mxu1 %v483_v0  ;;  %v555_v28 = vpack.c.bf16 %v111_v21, %v109_v20  ;;  %v110_v29 = vld [vmem:[%s1161_s0 + $0xf0] sm:$0xff]  ;;  %v429_v30 = vld [vmem:[%s1161_s0 + $0x308] sm:$0xff]  ;;  %v431_v31 = vld [vmem:[%s1161_s0 + $0x318] sm:$0xff]  ;;  %v493_v34 = vpack.c.bf16 %v426_v26, %v424_v25 }
  0x17   :  { %548 = vmatprep.subr.bf16.mxu0 %v547_v4  ;;  %v113_v32 = vld [vmem:[%s1161_s0 + $0x108] sm:$0xff]  ;;  %v115_v33 = vld [vmem:[%s1161_s0 + $0x118] sm:$0xff]  ;;  %v428_v35 = vld [vmem:[%s1161_s0 + $0x300] sm:$0xff]  ;;  %v557_v36 = vpack.c.bf16 %v110_v29, %v108_v27  ;;  %v495_v37 = vpack.c.bf16 %v431_v31, %v429_v30 }
  0x18   :  { %v430_v38 = vld [vmem:[%s1161_s0 + $0x310] sm:$0xff]  ;;  %v112_v39 = vld [vmem:[%s1161_s0 + $0x100] sm:$0xff]  ;;  %v559_v41 = vpack.c.bf16 %v115_v33, %v113_v32  ;;  %v433_v42 = vld [vmem:[%s1161_s0 + $0x328] sm:$0xff] }
  0x19   :  { %486 = vmatpush1.bf16.msra.mxu1 %v485_v10  ;;  %v114_v40 = vld [vmem:[%s1161_s0 + $0x110] sm:$0xff]  ;;  %v435_v43 = vld [vmem:[%s1161_s0 + $0x338] sm:$0xff]  ;;  %v117_v44 = vld [vmem:[%s1161_s0 + $0x128] sm:$0xff]  ;;  %v497_v48 = vpack.c.bf16 %v430_v38, %v428_v35 }
  0x1a   :  { %550 = vmatpush1.bf16.msra.mxu0 %v549_v11  ;;  %488 = vmatprep.subr.bf16.mxu1 %v487_v12  ;;  %v119_v45 = vld [vmem:[%s1161_s0 + $0x138] sm:$0xff]  ;;  %v849_v46 = vld [vmem:[%s1161_s0 + $0x320] sm:$0xff]  ;;  %v434_v47 = vld [vmem:[%s1161_s0 + $0x330] sm:$0xff]  ;;  %v561_v53 = vpack.c.bf16 %v114_v40, %v112_v39  ;;  %v499_v54 = vpack.c.bf16 %v435_v43, %v433_v42 }
  0x1b   :  { %552 = vmatprep.subr.bf16.mxu0 %v551_v16  ;;  %v857_v49 = vld [vmem:[%s1161_s0 + $0x120] sm:$0xff]  ;;  %v862_v50 = vld [vmem:[%s1161_s0 + $0x130] sm:$0xff]  ;;  %v867_v51 = vld [vmem:[%s1161_s0 + $0x348] sm:$0xff]  ;;  %v563_v59 = vpack.c.bf16 %v119_v45, %v117_v44  ;;  %v501_v12 = vpack.c.bf16 %v434_v47, %v849_v46 }
  0x1c   :  { %v872_v52 = vld [vmem:[%s1161_s0 + $0x358] sm:$0xff]  ;;  %v877_v55 = vld [vmem:[%s1161_s0 + $0x148] sm:$0xff]  ;;  %v885_v57 = vld [vmem:[%s1161_s0 + $0x340] sm:$0xff]  ;;  %v565_v18 = vpack.c.bf16 %v862_v50, %v857_v49 }
  0x1d   :  { %490 = vmatpush1.bf16.msra.mxu1 %v489_v22  ;;  %v123_v56 = vld [vmem:[%s1161_s0 + $0x158] sm:$0xff]  ;;  %v890_v58 = vld [vmem:[%s1161_s0 + $0x350] sm:$0xff]  ;;  %v895_v60 = vld [vmem:[%s1161_s0 + $0x140] sm:$0xff]  ;;  %v503_v19 = vpack.c.bf16 %v872_v52, %v867_v51 }
  0x1e   :  { %554 = vmatpush1.bf16.msra.mxu0 %v553_v23  ;;  %492 = vmatprep.subr.bf16.mxu1 %v491_v24  ;;  %v900_v61 = vld [vmem:[%s1161_s0 + $0x150] sm:$0xff]  ;;  %v905_v62 = vld [vmem:[%s1161_s0 + $0x368] sm:$0xff]  ;;  %v910_v63 = vld [vmem:[%s1161_s0 + $0x378] sm:$0xff]  ;;  %v567_v23 = vpack.c.bf16 %v123_v56, %v877_v55  ;;  %v505_v24 = vpack.c.bf16 %v890_v58, %v885_v57 }
  0x1f   :  { %556 = vmatprep.subr.bf16.mxu0 %v555_v28  ;;  %v915_v0 = vld [vmem:[%s1161_s0 + $0x168] sm:$0xff]  ;;  %v920_v1 = vld [vmem:[%s1161_s0 + $0x178] sm:$0xff]  ;;  %v925_v2 = vld [vmem:[%s1161_s0 + $0x360] sm:$0xff]  ;;  %v569_v28 = vpack.c.bf16 %v900_v61, %v895_v60  ;;  %v507_v29 = vpack.c.bf16 %v910_v63, %v905_v62 }
  0x20   :  { %v930_v3 = vld [vmem:[%s1161_s0 + $0x370] sm:$0xff]  ;;  %v935_v4 = vld [vmem:[%s1161_s0 + $0x160] sm:$0xff]  ;;  %v945_v6 = vld [vmem:[%s1161_s0 + $0x388] sm:$0xff]  ;;  %v571_v30 = vpack.c.bf16 %v920_v1, %v915_v0 }
  0x21   :  { %494 = vmatpush1.bf16.msra.mxu1 %v493_v34  ;;  %v940_v5 = vld [vmem:[%s1161_s0 + $0x170] sm:$0xff]  ;;  %v950_v7 = vld [vmem:[%s1161_s0 + $0x398] sm:$0xff]  ;;  %v955_v8 = vld [vmem:[%s1161_s0 + $0x188] sm:$0xff]  ;;  %v509_v31 = vpack.c.bf16 %v930_v3, %v925_v2 }
  0x22   :  { %558 = vmatpush1.bf16.msra.mxu0 %v557_v36  ;;  %496 = vmatprep.subr.bf16.mxu1 %v495_v37  ;;  %v960_v9 = vld [vmem:[%s1161_s0 + $0x198] sm:$0xff]  ;;  %v965_v10 = vld [vmem:[%s1161_s0 + $0x380] sm:$0xff]  ;;  %v970_v11 = vld [vmem:[%s1161_s0 + $0x390] sm:$0xff]  ;;  %v573_v35 = vpack.c.bf16 %v940_v5, %v935_v4  ;;  %v511_v36 = vpack.c.bf16 %v950_v7, %v945_v6 }
  0x23   :  { %560 = vmatprep.subr.bf16.mxu0 %v559_v41  ;;  %v976_v13 = vld [vmem:[%s1161_s0 + $0x180] sm:$0xff]  ;;  %v981_v14 = vld [vmem:[%s1161_s0 + $0x190] sm:$0xff]  ;;  %v986_v15 = vld [vmem:[%s1161_s0 + $0x3a8] sm:$0xff]  ;;  %v575_v37 = vpack.c.bf16 %v960_v9, %v955_v8  ;;  %v513_v38 = vpack.c.bf16 %v970_v11, %v965_v10 }
  0x24   :  { %v991_v16 = vld [vmem:[%s1161_s0 + $0x3b8] sm:$0xff]  ;;  %v996_v17 = vld [vmem:[%s1161_s0 + $0x1a8] sm:$0xff]  ;;  %v1010_v21 = vld [vmem:[%s1161_s0 + $0x3a0] sm:$0xff]  ;;  %v577_v41 = vpack.c.bf16 %v981_v14, %v976_v13 }
  0x25   :  { %498 = vmatpush1.bf16.msra.mxu1 %v497_v48  ;;  %v1005_v20 = vld [vmem:[%s1161_s0 + $0x1b8] sm:$0xff]  ;;  %v1015_v22 = vld [vmem:[%s1161_s0 + $0x3b0] sm:$0xff]  ;;  %v1023_v25 = vld [vmem:[%s1161_s0 + $0x1a0] sm:$0xff]  ;;  %v515_v42 = vpack.c.bf16 %v991_v16, %v986_v15 }
  0x26   :  { %562 = vmatpush1.bf16.msra.mxu0 %v561_v53  ;;  %500 = vmatprep.subr.bf16.mxu1 %v499_v54  ;;  %v1028_v26 = vld [vmem:[%s1161_s0 + $0x1b0] sm:$0xff]  ;;  %v1033_v27 = vld [vmem:[%s1161_s0 + $0x3c8] sm:$0xff]  ;;  %v1046_v32 = vld [vmem:[%s1161_s0 + $0x3d8] sm:$0xff]  ;;  %v579_v43 = vpack.c.bf16 %v1005_v20, %v996_v17  ;;  %v517_v44 = vpack.c.bf16 %v1015_v22, %v1010_v21 }
  0x27   :  { %564 = vmatprep.subr.bf16.mxu0 %v563_v59  ;;  %v1051_v33 = vld [vmem:[%s1161_s0 + $0x1c8] sm:$0xff]  ;;  %v1056_v34 = vld [vmem:[%s1161_s0 + $0x1d8] sm:$0xff]  ;;  %v1069_v39 = vld [vmem:[%s1161_s0 + $0x3c0] sm:$0xff]  ;;  %v581_v45 = vpack.c.bf16 %v1028_v26, %v1023_v25  ;;  %v519_v46 = vpack.c.bf16 %v1046_v32, %v1033_v27 }
  0x28   :  { %v1074_v40 = vld [vmem:[%s1161_s0 + $0x3d0] sm:$0xff]  ;;  %v583_v47 = vpack.c.bf16 %v1056_v34, %v1051_v33  ;;  %v11_v48 = vld [vmem:[%s1162_s1] sm:$0xff]  ;;  %v12_v50 = vld [vmem:[%s1162_s1 + $0x8] sm:$0xff] }
  0x29   :  { %502 = vmatpush1.bf16.msra.mxu1 %v501_v12  ;;  %v521_v49 = vpack.c.bf16 %v1074_v40, %v1069_v39  ;;  %v15_v51 = vcombine.high %v11_v48, %v11_v48  ;;  %v48_v52 = vsel %vm19_vm0, %v11_v48, -inf  ;;  %v20_v53 = vsel %vm19_vm0, %v11_v48, 0.0  ;;  %v136_v14 = vld [vmem:[%s1161_s0 + $0x1c0] sm:$0xff]  ;;  %v138_v15 = vld [vmem:[%s1161_s0 + $0x1d0] sm:$0xff] }
  0x2a   :  { %566 = vmatpush1.bf16.msra.mxu0 %v565_v18  ;;  %504 = vmatprep.subr.bf16.mxu1 %v503_v19  ;;  %v16_v54 = vcombine.high %v12_v50, %v12_v50  ;;  %v49_v55 = vrot.slane %v48_v52, 4  ;;  %v62_v56 = vsel %vm19_vm0, %v12_v50, -inf  ;;  %v21_v57 = vrot.slane %v20_v53, 4  ;;  %v458_v21 = vld [vmem:[%s1161_s0 + $0x3f0] sm:$0xff]  ;;  %v140_v26 = vld [vmem:[%s1161_s0 + $0x1e0] sm:$0xff] }
  0x2b   :  { %568 = vmatprep.subr.bf16.mxu0 %v567_v23  ;;  %v55_v58 = vsel %vm19_vm0, %v15_v51, -inf  ;;  %v27_v59 = vsel %vm19_vm0, %v15_v51, 0.0  ;;  %v63_v60 = vrot.slane %v62_v56, 4  ;;  %v34_v61 = vsel %vm19_vm0, %v12_v50, 0.0  ;;  %v142_v27 = vld [vmem:[%s1161_s0 + $0x1f0] sm:$0xff] }
  0x2c   :  { %v56_v62 = vrot.slane %v55_v58, 4  ;;  %v69_v63 = vsel %vm19_vm0, %v16_v54, -inf  ;;  %v28_v0 = vrot.slane %v27_v59, 4  ;;  %v41_v1 = vsel %vm19_vm0, %v16_v54, 0.0 }
  0x2d   :  { %506 = vmatpush1.bf16.msra.mxu1 %v505_v24  ;;  %v70_v2 = vrot.slane %v69_v63, 4  ;;  %v42_v3 = vrot.slane %v41_v1, 4  ;;  %v50_v4 = vmax.f32 %v48_v52, %v49_v55  ;;  %v64_v5 = vmax.f32 %v62_v56, %v63_v60 }
  0x2e   :  { %570 = vmatpush1.bf16.msra.mxu0 %v569_v28  ;;  %508 = vmatprep.subr.bf16.mxu1 %v507_v29  ;;  %v57_v6 = vmax.f32 %v55_v58, %v56_v62  ;;  %v29_v7 = vadd.f32 %v28_v0, %v27_v59  ;;  %v22_v8 = vadd.f32 %v21_v57, %v20_v53  ;;  %v35_v9 = vrot.slane %v34_v61, 4  ;;  %v141_v58 = vld [vmem:[%s1161_s0 + $0x1e8] sm:$0xff]  ;;  %v456_v62 = vld [vmem:[%s1161_s0 + $0x3e0] sm:$0xff] }
  0x2f   :  { %572 = vmatprep.subr.bf16.mxu0 %v571_v30  ;;  %v71_v10 = vmax.f32 %v69_v63, %v70_v2  ;;  %v43_v11 = vadd.f32 %v42_v3, %v41_v1  ;;  %v51_v12 = vrot.slane %v50_v4, 2  ;;  %v65_v13 = vrot.slane %v64_v5, 2 }
  0x30   :  { %v58_v16 = vrot.slane %v57_v6, 2  ;;  %v30_v18 = vrot.slane %v29_v7, 2  ;;  %v23_v19 = vrot.slane %v22_v8, 2  ;;  %v36_v23 = vadd.f32 %v35_v9, %v34_v61 }
  0x31   :  { %510 = vmatpush1.bf16.msra.mxu1 %v509_v31  ;;  %v72_v24 = vrot.slane %v71_v10, 2  ;;  %v44_v28 = vrot.slane %v43_v11, 2  ;;  %v52_v29 = vmax.f32 %v50_v4, %v51_v12  ;;  %v66_v30 = vmax.f32 %v64_v5, %v65_v13  ;;  %v457_v31 = vld [vmem:[%s1161_s0 + $0x3e8] sm:$0xff] }
  0x32   :  { %574 = vmatpush1.bf16.msra.mxu0 %v573_v35  ;;  %512 = vmatprep.subr.bf16.mxu1 %v511_v36  ;;  %v459_v35 = vld [vmem:[%s1161_s0 + $0x3f8] sm:$0xff]  ;;  %v59_v36 = vmax.f32 %v57_v6, %v58_v16  ;;  %v24_v48 = vadd.f32 %v23_v19, %v22_v8  ;;  %v37_v50 = vrot.slane %v36_v23, 2  ;;  %v585_v51 = vpack.c.bf16 %v138_v15, %v136_v14 }
  0x33   :  { %576 = vmatprep.subr.bf16.mxu0 %v575_v37  ;;  %v31_v37 = vadd.f32 %v30_v18, %v29_v7  ;;  %v73_v52 = vmax.f32 %v71_v10, %v72_v24  ;;  %v45_v53 = vadd.f32 %v44_v28, %v43_v11  ;;  %v523_v57 = vpack.c.bf16 %v459_v35, %v457_v31 }
  0x34   :  { %v25_v55 = vrot.slane %v24_v48, 1  ;;  %v38_v56 = vadd.f32 %v37_v50, %v36_v23  ;;  %v53_v60 = vrot.slane %v52_v29, 1  ;;  %v525_v33 = vpack.c.bf16 %v458_v21, %v456_v62 }
  0x35   :  { %514 = vmatpush1.bf16.msra.mxu1 %v513_v38  ;;  %v60_v38 = vrot.slane %v59_v36, 1  ;;  %v32_v54 = vrot.slane %v31_v37, 1  ;;  %v46_v59 = vrot.slane %v45_v53, 1  ;;  %v589_v1 = vpack.c.bf16 %v142_v27, %v140_v26 }
  0x36   :  { %578 = vmatpush1.bf16.msra.mxu0 %v577_v41  ;;  %516 = vmatprep.subr.bf16.mxu1 %v515_v42  ;;  %v143_v41 = vld [vmem:[%s1161_s0 + $0x1f8] sm:$0xff]  ;;  %v74_v42 = vrot.slane %v73_v52, 1  ;;  %v39_v61 = vrot.slane %v38_v56, 1  ;;  %v26_v63 = vadd.f32 %v25_v55, %v24_v48  ;;  %v54_v34 = vmax.f32 %v52_v29, %v53_v60 }
  0x37   :  { %580 = vmatprep.subr.bf16.mxu0 %v579_v43  ;;  %v61_v17 = vmax.f32 %v59_v36, %v60_v38  ;;  %v33_v20 = vadd.f32 %v32_v54, %v31_v37  ;;  %v67_v43 = vrot.slane %v66_v30, 1  ;;  %v587_v25 = vpack.c.bf16 %v143_v41, %v141_v58 }
  0x38   :  { %v75_v22 = vmax.f32 %v73_v52, %v74_v42  ;;  %v76_v3 = vmul.f32 0.25, %v26_v63 }
  0x39   :  { %518 = vmatpush1.bf16.msra.mxu1 %v517_v44  ;;  %v47_v44 = vadd.f32 %v46_v59, %v45_v53  ;;  %v77_v32 = vmul.f32 0.25, %v33_v20 }
  0x3a   :  { %582 = vmatpush1.bf16.msra.mxu0 %v581_v45  ;;  %520 = vmatprep.subr.bf16.mxu1 %v519_v46  ;;  %v40_v45 = vadd.f32 %v39_v61, %v38_v56  ;;  %v215_v46 = vsel %vm213_vm1, %v75_v22, %v61_v17 }
  0x3b   :  { %584 = vmatprep.subr.bf16.mxu0 %v583_v47  ;;  %v79_v0 = vmul.f32 0.25, %v47_v44  ;;  %282 = vmatprep.mubr.f32.mxu1 %v215_v46  ;;  %v68_v47 = vmax.f32 %v66_v30, %v67_v43 }
  0x3c   :  { %v78_v4 = vmul.f32 0.25, %v40_v45 }
  0x3d   :  { %522 = vmatpush1.bf16.msra.mxu1 %v521_v49  ;;  %v294_v2 = vsel %vm213_vm1, %v79_v0, %v77_v32  ;;  %v214_v5 = vsel %vm213_vm1, %v68_v47, %v54_v34 }
  0x3e   :  { %586 = vmatpush1.bf16.msra.mxu0 %v585_v51  ;;  %524 = vmatprep.subr.bf16.mxu1 %v523_v57  ;;  %v293_v39 = vsel %vm213_vm1, %v78_v4, %v76_v3 }
  0x3f   :  { %588 = vmatprep.subr.bf16.mxu0 %v587_v25  ;;  %361 = vmatprep.mubr.f32.mxu0 %v294_v2 }
  0x41   :  { %526 = vmatpush1.bf16.msra.mxu1 %v525_v33 }
  0x42   :  { %590 = vmatpush1.bf16.msra.mxu0 %v589_v1 }
  0x44   :  { %283 = vmatmul.mubr.f32.vlgmr.msra.gmra.mrb[0].mxu1 %v214_v5 }
  0x45   :  { %362 = vmatmul.mubr.f32.vlgmr.msra.gmra.mrb[0].mxu0 %v293_v39 }
 0x117   :  { %v284_v40 = vpop.f32.mrb[0].mxu1 }
 0x118   :  { %v363_v49 = vpop.f32.mrb[0].mxu0  ;;  %v286_v6 = vpop.f32.mrb[1].mxu1 }
 0x119   :  { %v364_v7 = vadd.f32 %v363_v49, %v284_v40  ;;  %v365_v8 = vpop.f32.mrb[1].mxu0 }
 0x11a   :  { %v366_v9 = vadd.f32 %v365_v8, %v286_v6 }
 0x11b   :  { %v460_v10 = vmul.f32 -1.442695, %v364_v7 }
 0x11c   :  { %v461_v11 = vmul.f32 -1.442695, %v366_v9 }
 0x11d   :  { %595 = vpow2.f32 %v460_v10 }
 0x11e   :  { %597 = vpow2.f32 %v461_v11 }
 0x127   :  { %v596_v12 = vpop.eup %595 }
 0x128   :  { %v598_v13 = vpop.eup %597  ;;  %v374_v14 = vadd.f32 1.0, %v596_v12 }
 0x129   :  { %v375_v15 = vadd.f32 1.0, %v598_v13 }
 0x12a   :  { %599 = vrcp.f32 %v374_v14 }
 0x12b   :  { %601 = vrcp.f32 %v375_v15 }
 0x134   :  { %v600_v16 = vpop.eup %599 }
 0x135   :  { %v602_v18 = vpop.eup %601 }
 0x136   :  { %v382_v19 = vcombine.low %v600_v16, %v602_v18 }
 0x138   :  { %462 = vst.sshfl [vmem:[%s1163_s2] sm:$0x33 pattern:$0x76325410] %v382_v19 }

</bundles_post_ra>
